<compile_context>
chip_gen: v5e
topology: v5e:2x2
jax: 0.10.0
libtpu: 0.0.40
codegen_flags: <defaults>
</compile_context>

<pallas_src>
import functools

import jax
import jax.numpy as jnp
from jax.experimental import pallas as pl
from jax.experimental.pallas import tpu as pltpu

F32 = jnp.float32


def _divisor_tile(m, target, mult):
    """Largest divisor of m that is <= target and a multiple of `mult`."""
    if m <= target:
        return m
    d = (target // mult) * mult
    while d >= mult:
        if m % d == 0:
            return d
        d -= mult
    return m


def _check_pixel_axis(M, tile):
    # Review concern: never silently fall back to one huge tile.
    assert (M % 128 == 0) or (M <= tile), (
        "OH*OW must be a multiple of 128 (or fit in one tile); pad out_size "
        f"instead of relying on a single {M}-wide block.")


# ----------------------------------------------------------------------------
# Kernel A: fused base-grid + TPS warp + coarse grid_sample of the affine grid
# ----------------------------------------------------------------------------
def _tps_coarse_kernel(H_in, W_in, base_ref, ctrl_ref, wT_ref, aT_ref, A_ref,
                       o_ref):
    gx = base_ref[0:1, :]                                   # (1, tm) output x
    gy = base_ref[1:2, :]                                   # (1, tm) output y

    # --- pytorch_tps.tps_grid: identity + U @ w + [1,gx,gy] @ a --------------
    cx = ctrl_ref[:, 0:1]                                   # (Tpad, 1)
    cy = ctrl_ref[:, 1:2]
    dx = gx - cx                                            # (Tpad, tm)
    dy = gy - cy
    d2 = dx * dx + dy * dy
    # U = D^2 * log(D + 1e-6)  ~=  0.5 * d2 * log(d2 + eps)   (no sqrt / EUP op)
    u = d2 * (0.5 * jnp.log(d2 + 1e-12))
    z = jnp.dot(wT_ref[...], u, preferred_element_type=F32)        # (2, tm)
    # Affine part of the TPS as scalar FMAs against SMEM scalars (review A2).
    zx = z[0:1, :] + aT_ref[0, 0] + aT_ref[0, 1] * gx + aT_ref[0, 2] * gy
    zy = z[1:2, :] + aT_ref[1, 0] + aT_ref[1, 1] * gx + aT_ref[1, 2] * gy
    tx = gx + zx                                                   # TPS grid x
    ty = gy + zy                                                   # TPS grid y

    # --- F.grid_sample(coarse_affine_grid, tps_grid, bilinear, zeros,
    #                   align_corners=True).
    # The sampled "image" is F.affine_grid's output, i.e. an affine function of
    # the integer pixel position, so the 4 corner values are computed
    # analytically instead of gathered.
    ix = (tx + 1.0) * (0.5 * (W_in - 1))
    iy = (ty + 1.0) * (0.5 * (H_in - 1))
    x0f = jnp.floor(ix)
    y0f = jnp.floor(iy)
    wx1 = ix - x0f
    wx0 = 1.0 - wx1
    wy1 = iy - y0f
    wy0 = 1.0 - wy1
    x0 = x0f.astype(jnp.int32)
    y0 = y0f.astype(jnp.int32)
    x1 = x0 + 1
    y1 = y0 + 1

    sx = jnp.zeros_like(gx)
    sy = jnp.zeros_like(gx)
    sw = jnp.zeros_like(gx)
    for xi, yi, wgt in ((x0, y0, wx0 * wy0), (x1, y0, wx1 * wy0),
                        (x0, y1, wx0 * wy1), (x1, y1, wx1 * wy1)):
        valid = ((xi >= 0) & (xi < W_in) & (yi >= 0) & (yi < H_in)).astype(F32)
        w = wgt * valid
        gxl = jnp.clip(xi, 0, W_in - 1).astype(F32) * (2.0 / (W_in - 1)) - 1.0
        gyl = jnp.clip(yi, 0, H_in - 1).astype(F32) * (2.0 / (H_in - 1)) - 1.0
        sx = sx + w * gxl
        sy = sy + w * gyl
        sw = sw + w
    # tps_grid value = affine_mat @ [sx, sy, sw]   (scalar FMA, SMEM scalars)
    ox = A_ref[0, 0] * sx + A_ref[0, 1] * sy + A_ref[0, 2] * sw
    oy = A_ref[1, 0] * sx + A_ref[1, 1] * sy + A_ref[1, 2] * sw
    o_ref[...] = jnp.concatenate([ox, oy], axis=0)                 # (2, tm)


def tps_coarse_grid(params, H_in, W_in, OH, OW, tile=4096):
    ctrl = params["ctrl"].astype(F32)                       # (T, 2)
    T = ctrl.shape[0]
    # Review A1: pad only to the next multiple of 8 (EUP/VPU work ~ Tpad).
    Tpad = max(8, ((T + 7) // 8) * 8)

    theta = params["theta"].astype(F32)                     # (T+2, 2)
    w_red = theta[:-3]
    a = theta[-3:]                                          # (3, 2)
    w_full = jnp.concatenate(
        [-jnp.sum(w_red, axis=0, keepdims=True), w_red], axis=0)      # (T, 2)
    w_pad = jnp.zeros((Tpad, 2), F32).at[:T].set(w_full)
    ctrl_pad = jnp.zeros((Tpad, 2), F32).at[:T].set(ctrl)
    wT = jnp.transpose(w_pad)                               # (2, Tpad)
    aT = jnp.transpose(a)                                   # (2, 3)  SMEM scalars
    A = params["affine_mat"].astype(F32).reshape(2, 3)      # SMEM scalars

    # base output grid (lane-dense (2, M)): x varies along W, y along H.
    xo = jnp.linspace(-1.0, 1.0, OW, dtype=F32)
    yo = jnp.linspace(-1.0, 1.0, OH, dtype=F32)
    gy_o, gx_o = jnp.meshgrid(yo, xo, indexing="ij")
    base_out = jnp.stack([gx_o.reshape(-1), gy_o.reshape(-1)], axis=0)  # (2, M)

    M = OH * OW
    _check_pixel_axis(M, tile)
    tm = _divisor_tile(M, tile, 128)
    kernel = functools.partial(_tps_coarse_kernel, H_in, W_in)
    return pl.pallas_call(
        kernel,
        out_shape=jax.ShapeDtypeStruct((2, M), F32),
        grid=(M // tm,),
        in_specs=[pl.BlockSpec((2, tm), lambda i: (0, i)),
                  pl.BlockSpec((Tpad, 2), lambda i: (0, 0)),
                  pl.BlockSpec((2, Tpad), lambda i: (0, 0)),
                  pl.BlockSpec(memory_space=pltpu.MemorySpace.SMEM),
                  pl.BlockSpec(memory_space=pltpu.MemorySpace.SMEM)],
        out_specs=pl.BlockSpec((2, tm), lambda i: (0, i)),
        compiler_params=pltpu.CompilerParams(
            dimension_semantics=("parallel",)),
    )(base_out, ctrl_pad, wT, aT, A)


# ----------------------------------------------------------------------------
# Kernel B: fused clamp(refine + tps_grid) + final grid_sample of the input
# ----------------------------------------------------------------------------
def _final_sample_kernel(H_in, W_in, Cp, refine_ref, tps_ref, img_ref, o_ref):
    # fine_grid = clamp(refine + tps_grid, -1, 1)   (fused epilogue)
    fg = jnp.clip(refine_ref[...] + tps_ref[...], -1.0, 1.0)          # (2, tm)
    ix = (fg[0:1, :] + 1.0) * (0.5 * (W_in - 1))
    iy = (fg[1:2, :] + 1.0) * (0.5 * (H_in - 1))
    x0f = jnp.floor(ix)
    y0f = jnp.floor(iy)
    wx1 = ix - x0f
    wx0 = 1.0 - wx1
    wy1 = iy - y0f
    wy0 = 1.0 - wy1
    x0 = x0f.astype(jnp.int32)
    y0 = y0f.astype(jnp.int32)
    tm = fg.shape[1]

    def two_hot(i0, w0, w1, extent):
        # (extent, tm): the two bilinear taps per pixel; out-of-range taps are
        # masked (padding_mode='zeros').  Kept in f32 (VPU); cast only at dot.
        i1 = i0 + 1
        v0 = w0 * ((i0 >= 0) & (i0 < extent)).astype(F32)
        v1 = w1 * ((i1 >= 0) & (i1 < extent)).astype(F32)
        i0c = jnp.clip(i0, 0, extent - 1)
        i1c = jnp.clip(i1, 0, extent - 1)
        rows = jax.lax.broadcasted_iota(jnp.int32, (extent, tm), 0)
        return (jnp.where(rows == i0c, v0, 0.0)
                + jnp.where(rows == i1c, v1, 0.0))

    wxT = two_hot(x0, wx0, wx1, W_in)                                  # (W, tm)
    wyT = two_hot(y0, wy0, wy1, H_in)                                  # (H, tm)
    wxT_b = wxT.astype(jnp.bfloat16)          # bf16 MXU operand (review B2)

    # Separable bilinear sample, per channel (review B1):
    #   out[c, m] = sum_y wyT[y, m] * sum_x img[c, y, x] * wxT[x, m]
    # TODO(synk): replace with an in-kernel gather (jnp.take / DMA gather) once
    # large-table gathers lower reliably in Mosaic; the separable 2-hot form
    # keeps the image VMEM-resident and needs no (M, H*W) matrix.
    rows = []
    for c in range(Cp):
        t = jnp.dot(img_ref[c], wxT_b, preferred_element_type=F32)    # (H, tm)
        rows.append(jnp.sum(t * wyT, axis=0, keepdims=True))          # (1, tm)
    o_ref[...] = jnp.concatenate(rows, axis=0)                        # (Cp, tm)


def final_grid_sample(x, refine2m, tps2m, tile=512):
    # tile=512 is safe for v5e's 16 MiB scoped default; can be raised to
    # 1024-2048 on v6e / v7x (keep M//tm even for the v7x megacore split).
    B, C, H_in, W_in = x.shape
    Cp = B * C
    M = tps2m.shape[1]
    _check_pixel_axis(M, tile)
    tm = _divisor_tile(M, tile, 128)
    img = x.reshape(Cp, H_in, W_in).astype(jnp.bfloat16)    # bf16 (review B3)
    kernel = functools.partial(_final_sample_kernel, H_in, W_in, Cp)
    return pl.pallas_call(
        kernel,
        out_shape=jax.ShapeDtypeStruct((Cp, M), F32),
        grid=(M // tm,),
        in_specs=[pl.BlockSpec((2, tm), lambda i: (0, i)),
                  pl.BlockSpec((2, tm), lambda i: (0, i)),
                  pl.BlockSpec((Cp, H_in, W_in), lambda i: (0, 0, 0))],
        out_specs=pl.BlockSpec((Cp, tm), lambda i: (0, i)),
        compiler_params=pltpu.CompilerParams(
            dimension_semantics=("parallel",)),
    )(refine2m.astype(F32), tps2m.astype(F32), img)


# ----------------------------------------------------------------------------
# Channel-major (lane-dense) matmul + bias + activation for the refine convs
# ----------------------------------------------------------------------------
def _cm_matmul_bias_act_kernel(act, w_ref, x_ref, b_ref, o_ref):
    y = jnp.dot(w_ref[...], x_ref[...], preferred_element_type=F32)   # (OC, tm)
    y = y + b_ref[...]                                                # (OC, 1)
    if act == "relu":
        y = jnp.maximum(y, 0.0)
    elif act == "leaky":                      # LeakyReLU(0.1)
        y = jnp.where(y >= 0.0, y, 0.1 * y)
    o_ref[...] = y


def matmul_bias_act_cm(w, x, b, act="none", tile=2048):
    """(OC, K) @ (K, M), pixel axis on lanes, output (OC, M).  Review C1."""
    OC, K = w.shape
    M = x.shape[1]
    tm = _divisor_tile(M, tile, 128)
    return pl.pallas_call(
        functools.partial(_cm_matmul_bias_act_kernel, act),
        out_shape=jax.ShapeDtypeStruct((OC, M), F32),
        grid=(M // tm,),
        in_specs=[pl.BlockSpec((OC, K), lambda i: (0, 0)),
                  pl.BlockSpec((K, tm), lambda i: (0, i)),
                  pl.BlockSpec((OC, 1), lambda i: (0, 0))],
        out_specs=pl.BlockSpec((OC, tm), lambda i: (0, i)),
        compiler_params=pltpu.CompilerParams(
            dimension_semantics=("parallel",)),
    )(w.astype(F32), x.astype(F32), b.reshape(OC, 1).astype(F32))


# ----------------------------------------------------------------------------
# JAX glue for the small refinement convs (channel-major layout plumbing only)
# ----------------------------------------------------------------------------
def _im2col_cm(x_chw, k, stride, pad):
    C, H, W = x_chw.shape
    xp = jnp.pad(x_chw, ((0, 0), (pad, pad), (pad, pad)))
    OH = (H + 2 * pad - k) // stride + 1
    OW = (W + 2 * pad - k) // stride + 1
    cols = []
    for ky in range(k):
        for kx in range(k):
            cols.append(xp[:, ky:ky + stride * (OH - 1) + 1:stride,
                              kx:kx + stride * (OW - 1) + 1:stride])  # (C,OH,OW)
    patches = jnp.stack(cols, axis=0)            # (k*k, C, OH, OW)
    return patches.reshape(k * k * C, OH * OW), OH, OW


def _conv3x3_s2_cm(x_chw, w_oihw, b, act):
    """nn.Conv2d(IC, OC, 3, stride=2, padding=1), channel-major in/out."""
    patches, OH, OW = _im2col_cm(x_chw, 3, 2, 1)
    OC = w_oihw.shape[0]
    w_mat = jnp.transpose(w_oihw, (0, 2, 3, 1)).reshape(OC, -1)   # (OC, 9*IC)
    y = matmul_bias_act_cm(w_mat, patches, b, act)                # (OC, OH*OW)
    return y.reshape(OC, OH, OW)


def _deconv2x2_s2_cm(x_chw, w_iohw, b, act):
    """nn.ConvTranspose2d(IC, OC, 2, stride=2, padding=0), channel-major."""
    C, H, W = x_chw.shape
    OC = w_iohw.shape[1]
    w_mat = jnp.transpose(w_iohw, (2, 3, 1, 0)).reshape(4 * OC, C)  # (4*OC, IC)
    y = matmul_bias_act_cm(w_mat, x_chw.reshape(C, H * W),
                           jnp.tile(b, 4), act)                     # (4*OC, HW)
    y = y.reshape(2, 2, OC, H, W).transpose(2, 3, 0, 4, 1)
    return y.reshape(OC, 2 * H, 2 * W)


# ----------------------------------------------------------------------------
# WarpingNet forward
# ----------------------------------------------------------------------------
def warping_net_forward(x, params, out_size):
    """x: (B, C, H, W) NCHW float32.  Returns (B, C, out_H, out_W)."""
    B, C, H_in, W_in = x.shape
    OH, OW = out_size
    M = OH * OW

    # Kernel A: fused affine-grid + TPS + coarse grid_sample -> (2, OH*OW).
    tps2m = tps_coarse_grid(params, H_in, W_in, OH, OW)

    # Grid refinement net (identical for every batch element -> run once).
    # Channel-major throughout: consumes/produces the (2, M)/(C, H, W) layout.
    y = _conv3x3_s2_cm(tps2m.reshape(2, OH, OW),
                       params["conv1_w"], params["conv1_b"], "relu")
    y = _conv3x3_s2_cm(y, params["conv2_w"], params["conv2_b"], "relu")
    y = _deconv2x2_s2_cm(y, params["deconv1_w"], params["deconv1_b"], "relu")
    y = _deconv2x2_s2_cm(y, params["deconv2_w"], params["deconv2_b"], "leaky")
    refine2m = y.reshape(2, M)                                     # lane-dense

    # Kernel B: fused clamp(refine + tps_grid) + final grid_sample of x.
    out = final_grid_sample(x, refine2m, tps2m)                    # (B*C, M)
    return out.reshape(B, C, OH, OW)


# ----------------------------------------------------------------------------
# Deterministic synthetic parameters (shapes from WarpingNet.__init__)
# ----------------------------------------------------------------------------
def init_params(key, grid_shape=(6, 6)):
    gh, gw = grid_shape
    cx = jnp.linspace(0.0, 1.0, gw, dtype=F32)
    cy = jnp.linspace(0.0, 1.0, gh, dtype=F32)
    cyy, cxx = jnp.meshgrid(cy, cx, indexing="ij")
    ctrl = jnp.stack([cxx.reshape(-1), cyy.reshape(-1)], axis=1)       # (36, 2)
    T = gh * gw
    ks = jax.random.split(key, 8)
    # nn.init.normal_(weight, 0, 0.0001) applied to Conv2d only; other params
    # initialized deterministically with small values (synthetic, no checkpoint).
    return {
        "affine_mat": jnp.array([[1.0, 0.0, 0.0], [0.0, 1.0, 0.0]], F32),
        "ctrl": ctrl,
        "theta": jnp.full((T + 2, 2), 1e-3, F32),
        "conv1_w": 1e-4 * jax.random.normal(ks[0], (32, 2, 3, 3), F32),
        "conv1_b": 1e-2 * jax.random.normal(ks[1], (32,), F32),
        "conv2_w": 1e-4 * jax.random.normal(ks[2], (64, 32, 3, 3), F32),
        "conv2_b": 1e-2 * jax.random.normal(ks[3], (64,), F32),
        "deconv1_w": 5e-2 * jax.random.normal(ks[4], (64, 32, 2, 2), F32),
        "deconv1_b": 1e-2 * jax.random.normal(ks[5], (32,), F32),
        "deconv2_w": 5e-2 * jax.random.normal(ks[6], (32, 2, 2, 2), F32),
        "deconv2_b": 1e-2 * jax.random.normal(ks[7], (2,), F32),
    }


if __name__ == "__main__":
    key = jax.random.PRNGKey(0)
    k_x, k_p = jax.random.split(key)
    B, C, H, W = 2, 4, 16, 16
    out_size = (16, 16)          # small stand-in for the default (256, 256)

    x = jax.random.normal(k_x, (B, C, H, W), F32)
    params = init_params(k_p, grid_shape=(6, 6))

    out = warping_net_forward(x, params, out_size)
    out = jax.block_until_ready(out)

    assert out.shape == (B, C, out_size[0], out_size[1]), out.shape
    assert bool(jnp.all(jnp.isfinite(out)))
    print("KERNEL_OK")
</pallas_src>

<mosaic_0001>
module attributes {stable_mosaic.version = 11 : i64} {
  func.func @_tps_coarse_kernel(%arg0: i32, %arg1: memref<2x256xf32, #tpu.memory_space<vmem>>, %arg2: memref<40x2xf32, #tpu.memory_space<vmem>>, %arg3: memref<2x40xf32, #tpu.memory_space<vmem>>, %arg4: memref<2x3xf32, #tpu.memory_space<smem>>, %arg5: memref<2x3xf32, #tpu.memory_space<smem>>, %arg6: memref<2x256xf32, #tpu.memory_space<vmem>>) attributes {dimension_semantics = [#tpu.dimension_semantics<parallel>], iteration_bounds = array<i64: 1>, scalar_prefetch = 0 : i64, scratch_operands = 0 : i64, tpu.core_type = #tpu.core_type<tc>, window_params = [{transform_indices = @transform_0, window_bounds = array<i64: 2, 256>}, {pipeline_mode = #tpu.pipeline_mode<synchronous>, transform_indices = @transform_1, window_bounds = array<i64: 40, 2>}, {pipeline_mode = #tpu.pipeline_mode<synchronous>, transform_indices = @transform_2, window_bounds = array<i64: 2, 40>}, {transform_indices = @transform_3, window_bounds = array<i64: 2, 3>}, {transform_indices = @transform_4, window_bounds = array<i64: 2, 3>}, {transform_indices = @transform_5, window_bounds = array<i64: 2, 256>}]} {
    %c0 = arith.constant 0 : index
    %c0_0 = arith.constant 0 : index
    %0 = vector.load %arg1[%c0, %c0_0] : memref<2x256xf32, #tpu.memory_space<vmem>>, vector<1x256xf32>
    %c1 = arith.constant 1 : index
    %c0_1 = arith.constant 0 : index
    %1 = vector.load %arg1[%c1, %c0_1] : memref<2x256xf32, #tpu.memory_space<vmem>>, vector<1x256xf32>
    %c0_2 = arith.constant 0 : index
    %c0_3 = arith.constant 0 : index
    %2 = vector.load %arg2[%c0_2, %c0_3] : memref<40x2xf32, #tpu.memory_space<vmem>>, vector<40x1xf32>
    %c0_4 = arith.constant 0 : index
    %c1_5 = arith.constant 1 : index
    %3 = vector.load %arg2[%c0_4, %c1_5] : memref<40x2xf32, #tpu.memory_space<vmem>>, vector<40x1xf32>
    %4 = vector.broadcast %0 : vector<1x256xf32> to vector<40x256xf32>
    %5 = vector.broadcast %2 : vector<40x1xf32> to vector<40x256xf32>
    %6 = arith.subf %4, %5 : vector<40x256xf32>
    %7 = vector.broadcast %1 : vector<1x256xf32> to vector<40x256xf32>
    %8 = vector.broadcast %3 : vector<40x1xf32> to vector<40x256xf32>
    %9 = arith.subf %7, %8 : vector<40x256xf32>
    %10 = arith.mulf %6, %6 : vector<40x256xf32>
    %11 = arith.mulf %9, %9 : vector<40x256xf32>
    %12 = arith.addf %10, %11 : vector<40x256xf32>
    %cst = arith.constant 9.99999996E-13 : f32
    %13 = vector.broadcast %cst : f32 to vector<40x256xf32>
    %14 = arith.addf %12, %13 : vector<40x256xf32>
    %15 = math.log %14 : vector<40x256xf32>
    %cst_6 = arith.constant 5.000000e-01 : f32
    %16 = vector.broadcast %cst_6 : f32 to vector<40x256xf32>
    %17 = arith.mulf %16, %15 : vector<40x256xf32>
    %18 = arith.mulf %12, %17 : vector<40x256xf32>
    %c0_7 = arith.constant 0 : index
    %c0_8 = arith.constant 0 : index
    %19 = vector.load %arg3[%c0_7, %c0_8] : memref<2x40xf32, #tpu.memory_space<vmem>>, vector<2x40xf32>
    %cst_9 = arith.constant dense<0.000000e+00> : vector<2x256xf32>
    %20 = tpu.matmul %19, %18, %cst_9 {dimension_numbers = #tpu.dot_dimension_numbers<[1], [0], [0], [1], [0, 0, 1, 1], [], []>} : vector<2x40xf32>, vector<40x256xf32>, vector<2x256xf32> -> vector<2x256xf32>
    %21 = vector.extract_strided_slice %20 {offsets = [0, 0], sizes = [1, 256], strides = [1, 1]} : vector<2x256xf32> to vector<1x256xf32>
    %c0_10 = arith.constant 0 : index
    %c0_11 = arith.constant 0 : index
    %22 = memref.load %arg4[%c0_10, %c0_11] : memref<2x3xf32, #tpu.memory_space<smem>>
    %23 = vector.broadcast %22 : f32 to vector<1x256xf32>
    %24 = arith.addf %21, %23 : vector<1x256xf32>
    %c0_12 = arith.constant 0 : index
    %c1_13 = arith.constant 1 : index
    %25 = memref.load %arg4[%c0_12, %c1_13] : memref<2x3xf32, #tpu.memory_space<smem>>
    %26 = vector.broadcast %25 : f32 to vector<1x256xf32>
    %27 = arith.mulf %26, %0 : vector<1x256xf32>
    %28 = arith.addf %24, %27 : vector<1x256xf32>
    %c0_14 = arith.constant 0 : index
    %c2 = arith.constant 2 : index
    %29 = memref.load %arg4[%c0_14, %c2] : memref<2x3xf32, #tpu.memory_space<smem>>
    %30 = vector.broadcast %29 : f32 to vector<1x256xf32>
    %31 = arith.mulf %30, %1 : vector<1x256xf32>
    %32 = arith.addf %28, %31 : vector<1x256xf32>
    %33 = vector.extract_strided_slice %20 {offsets = [1, 0], sizes = [1, 256], strides = [1, 1]} : vector<2x256xf32> to vector<1x256xf32>
    %c1_15 = arith.constant 1 : index
    %c0_16 = arith.constant 0 : index
    %34 = memref.load %arg4[%c1_15, %c0_16] : memref<2x3xf32, #tpu.memory_space<smem>>
    %35 = vector.broadcast %34 : f32 to vector<1x256xf32>
    %36 = arith.addf %33, %35 : vector<1x256xf32>
    %c1_17 = arith.constant 1 : index
    %c1_18 = arith.constant 1 : index
    %37 = memref.load %arg4[%c1_17, %c1_18] : memref<2x3xf32, #tpu.memory_space<smem>>
    %38 = vector.broadcast %37 : f32 to vector<1x256xf32>
    %39 = arith.mulf %38, %0 : vector<1x256xf32>
    %40 = arith.addf %36, %39 : vector<1x256xf32>
    %c1_19 = arith.constant 1 : index
    %c2_20 = arith.constant 2 : index
    %41 = memref.load %arg4[%c1_19, %c2_20] : memref<2x3xf32, #tpu.memory_space<smem>>
    %42 = vector.broadcast %41 : f32 to vector<1x256xf32>
    %43 = arith.mulf %42, %1 : vector<1x256xf32>
    %44 = arith.addf %40, %43 : vector<1x256xf32>
    %45 = arith.addf %0, %32 : vector<1x256xf32>
    %46 = arith.addf %1, %44 : vector<1x256xf32>
    %cst_21 = arith.constant 1.000000e+00 : f32
    %47 = vector.broadcast %cst_21 : f32 to vector<1x256xf32>
    %48 = arith.addf %45, %47 : vector<1x256xf32>
    %cst_22 = arith.constant 7.500000e+00 : f32
    %49 = vector.broadcast %cst_22 : f32 to vector<1x256xf32>
    %50 = arith.mulf %48, %49 : vector<1x256xf32>
    %cst_23 = arith.constant 1.000000e+00 : f32
    %51 = vector.broadcast %cst_23 : f32 to vector<1x256xf32>
    %52 = arith.addf %46, %51 : vector<1x256xf32>
    %cst_24 = arith.constant 7.500000e+00 : f32
    %53 = vector.broadcast %cst_24 : f32 to vector<1x256xf32>
    %54 = arith.mulf %52, %53 : vector<1x256xf32>
    %55 = math.floor %50 : vector<1x256xf32>
    %56 = math.floor %54 : vector<1x256xf32>
    %57 = arith.subf %50, %55 : vector<1x256xf32>
    %cst_25 = arith.constant 1.000000e+00 : f32
    %58 = vector.broadcast %cst_25 : f32 to vector<1x256xf32>
    %59 = arith.subf %58, %57 : vector<1x256xf32>
    %60 = arith.subf %54, %56 : vector<1x256xf32>
    %cst_26 = arith.constant 1.000000e+00 : f32
    %61 = vector.broadcast %cst_26 : f32 to vector<1x256xf32>
    %62 = arith.subf %61, %60 : vector<1x256xf32>
    %63 = arith.fptosi %55 : vector<1x256xf32> to vector<1x256xi32>
    %64 = arith.fptosi %56 : vector<1x256xf32> to vector<1x256xi32>
    %c1_i32 = arith.constant 1 : i32
    %65 = vector.broadcast %c1_i32 : i32 to vector<1x256xi32>
    %66 = arith.addi %63, %65 : vector<1x256xi32>
    %c1_i32_27 = arith.constant 1 : i32
    %67 = vector.broadcast %c1_i32_27 : i32 to vector<1x256xi32>
    %68 = arith.addi %64, %67 : vector<1x256xi32>
    %cst_28 = arith.constant 0.000000e+00 : f32
    %69 = vector.broadcast %cst_28 : f32 to vector<1x256xf32>
    %cst_29 = arith.constant 0.000000e+00 : f32
    %70 = vector.broadcast %cst_29 : f32 to vector<1x256xf32>
    %cst_30 = arith.constant 0.000000e+00 : f32
    %71 = vector.broadcast %cst_30 : f32 to vector<1x256xf32>
    %72 = arith.mulf %59, %62 : vector<1x256xf32>
    %73 = arith.mulf %57, %62 : vector<1x256xf32>
    %74 = arith.mulf %59, %60 : vector<1x256xf32>
    %75 = arith.mulf %57, %60 : vector<1x256xf32>
    %c0_i32 = arith.constant 0 : i32
    %76 = vector.broadcast %c0_i32 : i32 to vector<1x256xi32>
    %77 = arith.cmpi sge, %63, %76 : vector<1x256xi32>
    %c16_i32 = arith.constant 16 : i32
    %78 = vector.broadcast %c16_i32 : i32 to vector<1x256xi32>
    %79 = arith.cmpi slt, %63, %78 : vector<1x256xi32>
    %80 = arith.andi %77, %79 : vector<1x256xi1>
    %c0_i32_31 = arith.constant 0 : i32
    %81 = vector.broadcast %c0_i32_31 : i32 to vector<1x256xi32>
    %82 = arith.cmpi sge, %64, %81 : vector<1x256xi32>
    %83 = arith.andi %80, %82 : vector<1x256xi1>
    %c16_i32_32 = arith.constant 16 : i32
    %84 = vector.broadcast %c16_i32_32 : i32 to vector<1x256xi32>
    %85 = arith.cmpi slt, %64, %84 : vector<1x256xi32>
    %86 = arith.andi %83, %85 : vector<1x256xi1>
    %87 = arith.extui %86 : vector<1x256xi1> to vector<1x256xi32>
    %88 = arith.sitofp %87 : vector<1x256xi32> to vector<1x256xf32>
    %89 = arith.mulf %72, %88 : vector<1x256xf32>
    %c0_i32_33 = arith.constant 0 : i32
    %c15_i32 = arith.constant 15 : i32
    %90 = vector.broadcast %c0_i32_33 : i32 to vector<1x256xi32>
    %91 = arith.maxsi %90, %63 : vector<1x256xi32>
    %92 = vector.broadcast %c15_i32 : i32 to vector<1x256xi32>
    %93 = arith.minsi %92, %91 : vector<1x256xi32>
    %94 = arith.sitofp %93 : vector<1x256xi32> to vector<1x256xf32>
    %cst_34 = arith.constant 0.13333334 : f32
    %95 = vector.broadcast %cst_34 : f32 to vector<1x256xf32>
    %96 = arith.mulf %94, %95 : vector<1x256xf32>
    %cst_35 = arith.constant 1.000000e+00 : f32
    %97 = vector.broadcast %cst_35 : f32 to vector<1x256xf32>
    %98 = arith.subf %96, %97 : vector<1x256xf32>
    %c0_i32_36 = arith.constant 0 : i32
    %c15_i32_37 = arith.constant 15 : i32
    %99 = vector.broadcast %c0_i32_36 : i32 to vector<1x256xi32>
    %100 = arith.maxsi %99, %64 : vector<1x256xi32>
    %101 = vector.broadcast %c15_i32_37 : i32 to vector<1x256xi32>
    %102 = arith.minsi %101, %100 : vector<1x256xi32>
    %103 = arith.sitofp %102 : vector<1x256xi32> to vector<1x256xf32>
    %cst_38 = arith.constant 0.13333334 : f32
    %104 = vector.broadcast %cst_38 : f32 to vector<1x256xf32>
    %105 = arith.mulf %103, %104 : vector<1x256xf32>
    %cst_39 = arith.constant 1.000000e+00 : f32
    %106 = vector.broadcast %cst_39 : f32 to vector<1x256xf32>
    %107 = arith.subf %105, %106 : vector<1x256xf32>
    %108 = arith.mulf %89, %98 : vector<1x256xf32>
    %109 = arith.addf %69, %108 : vector<1x256xf32>
    %110 = arith.mulf %89, %107 : vector<1x256xf32>
    %111 = arith.addf %70, %110 : vector<1x256xf32>
    %112 = arith.addf %71, %89 : vector<1x256xf32>
    %c0_i32_40 = arith.constant 0 : i32
    %113 = vector.broadcast %c0_i32_40 : i32 to vector<1x256xi32>
    %114 = arith.cmpi sge, %66, %113 : vector<1x256xi32>
    %c16_i32_41 = arith.constant 16 : i32
    %115 = vector.broadcast %c16_i32_41 : i32 to vector<1x256xi32>
    %116 = arith.cmpi slt, %66, %115 : vector<1x256xi32>
    %117 = arith.andi %114, %116 : vector<1x256xi1>
    %c0_i32_42 = arith.constant 0 : i32
    %118 = vector.broadcast %c0_i32_42 : i32 to vector<1x256xi32>
    %119 = arith.cmpi sge, %64, %118 : vector<1x256xi32>
    %120 = arith.andi %117, %119 : vector<1x256xi1>
    %c16_i32_43 = arith.constant 16 : i32
    %121 = vector.broadcast %c16_i32_43 : i32 to vector<1x256xi32>
    %122 = arith.cmpi slt, %64, %121 : vector<1x256xi32>
    %123 = arith.andi %120, %122 : vector<1x256xi1>
    %124 = arith.extui %123 : vector<1x256xi1> to vector<1x256xi32>
    %125 = arith.sitofp %124 : vector<1x256xi32> to vector<1x256xf32>
    %126 = arith.mulf %73, %125 : vector<1x256xf32>
    %c0_i32_44 = arith.constant 0 : i32
    %c15_i32_45 = arith.constant 15 : i32
    %127 = vector.broadcast %c0_i32_44 : i32 to vector<1x256xi32>
    %128 = arith.maxsi %127, %66 : vector<1x256xi32>
    %129 = vector.broadcast %c15_i32_45 : i32 to vector<1x256xi32>
    %130 = arith.minsi %129, %128 : vector<1x256xi32>
    %131 = arith.sitofp %130 : vector<1x256xi32> to vector<1x256xf32>
    %cst_46 = arith.constant 0.13333334 : f32
    %132 = vector.broadcast %cst_46 : f32 to vector<1x256xf32>
    %133 = arith.mulf %131, %132 : vector<1x256xf32>
    %cst_47 = arith.constant 1.000000e+00 : f32
    %134 = vector.broadcast %cst_47 : f32 to vector<1x256xf32>
    %135 = arith.subf %133, %134 : vector<1x256xf32>
    %c0_i32_48 = arith.constant 0 : i32
    %c15_i32_49 = arith.constant 15 : i32
    %136 = vector.broadcast %c0_i32_48 : i32 to vector<1x256xi32>
    %137 = arith.maxsi %136, %64 : vector<1x256xi32>
    %138 = vector.broadcast %c15_i32_49 : i32 to vector<1x256xi32>
    %139 = arith.minsi %138, %137 : vector<1x256xi32>
    %140 = arith.sitofp %139 : vector<1x256xi32> to vector<1x256xf32>
    %cst_50 = arith.constant 0.13333334 : f32
    %141 = vector.broadcast %cst_50 : f32 to vector<1x256xf32>
    %142 = arith.mulf %140, %141 : vector<1x256xf32>
    %cst_51 = arith.constant 1.000000e+00 : f32
    %143 = vector.broadcast %cst_51 : f32 to vector<1x256xf32>
    %144 = arith.subf %142, %143 : vector<1x256xf32>
    %145 = arith.mulf %126, %135 : vector<1x256xf32>
    %146 = arith.addf %109, %145 : vector<1x256xf32>
    %147 = arith.mulf %126, %144 : vector<1x256xf32>
    %148 = arith.addf %111, %147 : vector<1x256xf32>
    %149 = arith.addf %112, %126 : vector<1x256xf32>
    %c0_i32_52 = arith.constant 0 : i32
    %150 = vector.broadcast %c0_i32_52 : i32 to vector<1x256xi32>
    %151 = arith.cmpi sge, %63, %150 : vector<1x256xi32>
    %c16_i32_53 = arith.constant 16 : i32
    %152 = vector.broadcast %c16_i32_53 : i32 to vector<1x256xi32>
    %153 = arith.cmpi slt, %63, %152 : vector<1x256xi32>
    %154 = arith.andi %151, %153 : vector<1x256xi1>
    %c0_i32_54 = arith.constant 0 : i32
    %155 = vector.broadcast %c0_i32_54 : i32 to vector<1x256xi32>
    %156 = arith.cmpi sge, %68, %155 : vector<1x256xi32>
    %157 = arith.andi %154, %156 : vector<1x256xi1>
    %c16_i32_55 = arith.constant 16 : i32
    %158 = vector.broadcast %c16_i32_55 : i32 to vector<1x256xi32>
    %159 = arith.cmpi slt, %68, %158 : vector<1x256xi32>
    %160 = arith.andi %157, %159 : vector<1x256xi1>
    %161 = arith.extui %160 : vector<1x256xi1> to vector<1x256xi32>
    %162 = arith.sitofp %161 : vector<1x256xi32> to vector<1x256xf32>
    %163 = arith.mulf %74, %162 : vector<1x256xf32>
    %c0_i32_56 = arith.constant 0 : i32
    %c15_i32_57 = arith.constant 15 : i32
    %164 = vector.broadcast %c0_i32_56 : i32 to vector<1x256xi32>
    %165 = arith.maxsi %164, %63 : vector<1x256xi32>
    %166 = vector.broadcast %c15_i32_57 : i32 to vector<1x256xi32>
    %167 = arith.minsi %166, %165 : vector<1x256xi32>
    %168 = arith.sitofp %167 : vector<1x256xi32> to vector<1x256xf32>
    %cst_58 = arith.constant 0.13333334 : f32
    %169 = vector.broadcast %cst_58 : f32 to vector<1x256xf32>
    %170 = arith.mulf %168, %169 : vector<1x256xf32>
    %cst_59 = arith.constant 1.000000e+00 : f32
    %171 = vector.broadcast %cst_59 : f32 to vector<1x256xf32>
    %172 = arith.subf %170, %171 : vector<1x256xf32>
    %c0_i32_60 = arith.constant 0 : i32
    %c15_i32_61 = arith.constant 15 : i32
    %173 = vector.broadcast %c0_i32_60 : i32 to vector<1x256xi32>
    %174 = arith.maxsi %173, %68 : vector<1x256xi32>
    %175 = vector.broadcast %c15_i32_61 : i32 to vector<1x256xi32>
    %176 = arith.minsi %175, %174 : vector<1x256xi32>
    %177 = arith.sitofp %176 : vector<1x256xi32> to vector<1x256xf32>
    %cst_62 = arith.constant 0.13333334 : f32
    %178 = vector.broadcast %cst_62 : f32 to vector<1x256xf32>
    %179 = arith.mulf %177, %178 : vector<1x256xf32>
    %cst_63 = arith.constant 1.000000e+00 : f32
    %180 = vector.broadcast %cst_63 : f32 to vector<1x256xf32>
    %181 = arith.subf %179, %180 : vector<1x256xf32>
    %182 = arith.mulf %163, %172 : vector<1x256xf32>
    %183 = arith.addf %146, %182 : vector<1x256xf32>
    %184 = arith.mulf %163, %181 : vector<1x256xf32>
    %185 = arith.addf %148, %184 : vector<1x256xf32>
    %186 = arith.addf %149, %163 : vector<1x256xf32>
    %c0_i32_64 = arith.constant 0 : i32
    %187 = vector.broadcast %c0_i32_64 : i32 to vector<1x256xi32>
    %188 = arith.cmpi sge, %66, %187 : vector<1x256xi32>
    %c16_i32_65 = arith.constant 16 : i32
    %189 = vector.broadcast %c16_i32_65 : i32 to vector<1x256xi32>
    %190 = arith.cmpi slt, %66, %189 : vector<1x256xi32>
    %191 = arith.andi %188, %190 : vector<1x256xi1>
    %c0_i32_66 = arith.constant 0 : i32
    %192 = vector.broadcast %c0_i32_66 : i32 to vector<1x256xi32>
    %193 = arith.cmpi sge, %68, %192 : vector<1x256xi32>
    %194 = arith.andi %191, %193 : vector<1x256xi1>
    %c16_i32_67 = arith.constant 16 : i32
    %195 = vector.broadcast %c16_i32_67 : i32 to vector<1x256xi32>
    %196 = arith.cmpi slt, %68, %195 : vector<1x256xi32>
    %197 = arith.andi %194, %196 : vector<1x256xi1>
    %198 = arith.extui %197 : vector<1x256xi1> to vector<1x256xi32>
    %199 = arith.sitofp %198 : vector<1x256xi32> to vector<1x256xf32>
    %200 = arith.mulf %75, %199 : vector<1x256xf32>
    %c0_i32_68 = arith.constant 0 : i32
    %c15_i32_69 = arith.constant 15 : i32
    %201 = vector.broadcast %c0_i32_68 : i32 to vector<1x256xi32>
    %202 = arith.maxsi %201, %66 : vector<1x256xi32>
    %203 = vector.broadcast %c15_i32_69 : i32 to vector<1x256xi32>
    %204 = arith.minsi %203, %202 : vector<1x256xi32>
    %205 = arith.sitofp %204 : vector<1x256xi32> to vector<1x256xf32>
    %cst_70 = arith.constant 0.13333334 : f32
    %206 = vector.broadcast %cst_70 : f32 to vector<1x256xf32>
    %207 = arith.mulf %205, %206 : vector<1x256xf32>
    %cst_71 = arith.constant 1.000000e+00 : f32
    %208 = vector.broadcast %cst_71 : f32 to vector<1x256xf32>
    %209 = arith.subf %207, %208 : vector<1x256xf32>
    %c0_i32_72 = arith.constant 0 : i32
    %c15_i32_73 = arith.constant 15 : i32
    %210 = vector.broadcast %c0_i32_72 : i32 to vector<1x256xi32>
    %211 = arith.maxsi %210, %68 : vector<1x256xi32>
    %212 = vector.broadcast %c15_i32_73 : i32 to vector<1x256xi32>
    %213 = arith.minsi %212, %211 : vector<1x256xi32>
    %214 = arith.sitofp %213 : vector<1x256xi32> to vector<1x256xf32>
    %cst_74 = arith.constant 0.13333334 : f32
    %215 = vector.broadcast %cst_74 : f32 to vector<1x256xf32>
    %216 = arith.mulf %214, %215 : vector<1x256xf32>
    %cst_75 = arith.constant 1.000000e+00 : f32
    %217 = vector.broadcast %cst_75 : f32 to vector<1x256xf32>
    %218 = arith.subf %216, %217 : vector<1x256xf32>
    %219 = arith.mulf %200, %209 : vector<1x256xf32>
    %220 = arith.addf %183, %219 : vector<1x256xf32>
    %221 = arith.mulf %200, %218 : vector<1x256xf32>
    %222 = arith.addf %185, %221 : vector<1x256xf32>
    %223 = arith.addf %186, %200 : vector<1x256xf32>
    %c0_76 = arith.constant 0 : index
    %c0_77 = arith.constant 0 : index
    %224 = memref.load %arg5[%c0_76, %c0_77] : memref<2x3xf32, #tpu.memory_space<smem>>
    %225 = vector.broadcast %224 : f32 to vector<1x256xf32>
    %226 = arith.mulf %225, %220 : vector<1x256xf32>
    %c0_78 = arith.constant 0 : index
    %c1_79 = arith.constant 1 : index
    %227 = memref.load %arg5[%c0_78, %c1_79] : memref<2x3xf32, #tpu.memory_space<smem>>
    %228 = vector.broadcast %227 : f32 to vector<1x256xf32>
    %229 = arith.mulf %228, %222 : vector<1x256xf32>
    %230 = arith.addf %226, %229 : vector<1x256xf32>
    %c0_80 = arith.constant 0 : index
    %c2_81 = arith.constant 2 : index
    %231 = memref.load %arg5[%c0_80, %c2_81] : memref<2x3xf32, #tpu.memory_space<smem>>
    %232 = vector.broadcast %231 : f32 to vector<1x256xf32>
    %233 = arith.mulf %232, %223 : vector<1x256xf32>
    %234 = arith.addf %230, %233 : vector<1x256xf32>
    %c1_82 = arith.constant 1 : index
    %c0_83 = arith.constant 0 : index
    %235 = memref.load %arg5[%c1_82, %c0_83] : memref<2x3xf32, #tpu.memory_space<smem>>
    %236 = vector.broadcast %235 : f32 to vector<1x256xf32>
    %237 = arith.mulf %236, %220 : vector<1x256xf32>
    %c1_84 = arith.constant 1 : index
    %c1_85 = arith.constant 1 : index
    %238 = memref.load %arg5[%c1_84, %c1_85] : memref<2x3xf32, #tpu.memory_space<smem>>
    %239 = vector.broadcast %238 : f32 to vector<1x256xf32>
    %240 = arith.mulf %239, %222 : vector<1x256xf32>
    %241 = arith.addf %237, %240 : vector<1x256xf32>
    %c1_86 = arith.constant 1 : index
    %c2_87 = arith.constant 2 : index
    %242 = memref.load %arg5[%c1_86, %c2_87] : memref<2x3xf32, #tpu.memory_space<smem>>
    %243 = vector.broadcast %242 : f32 to vector<1x256xf32>
    %244 = arith.mulf %243, %223 : vector<1x256xf32>
    %245 = arith.addf %241, %244 : vector<1x256xf32>
    %246 = tpu.concatenate %234, %245 in 0 : vector<1x256xf32>, vector<1x256xf32> -> vector<2x256xf32>
    %c0_88 = arith.constant 0 : index
    %c0_89 = arith.constant 0 : index
    %247 = vector.load %arg6[%c0_88, %c0_89] : memref<2x256xf32, #tpu.memory_space<vmem>>, vector<2x256xf32>
    tpu.vector_store %arg6[%c0_88, %c0_89], %246 {strides = array<i32>} : memref<2x256xf32, #tpu.memory_space<vmem>>, vector<2x256xf32>,
    return
  }
  func.func @transform_0(%arg0: i32) -> (i32, i32) {
    %c0_i32 = arith.constant 0 : i32
    %c0_i32_0 = arith.constant 0 : i32
    return %c0_i32, %arg0 : i32, i32
  }
  func.func @transform_1(%arg0: i32) -> (i32, i32) {
    %c0_i32 = arith.constant 0 : i32
    %c0_i32_0 = arith.constant 0 : i32
    %c0_i32_1 = arith.constant 0 : i32
    return %c0_i32, %c0_i32_0 : i32, i32
  }
  func.func @transform_2(%arg0: i32) -> (i32, i32) {
    %c0_i32 = arith.constant 0 : i32
    %c0_i32_0 = arith.constant 0 : i32
    %c0_i32_1 = arith.constant 0 : i32
    return %c0_i32, %c0_i32_0 : i32, i32
  }
  func.func @transform_3(%arg0: i32) -> (i32, i32) {
    %c0_i32 = arith.constant 0 : i32
    %c0_i32_0 = arith.constant 0 : i32
    %c0_i32_1 = arith.constant 0 : i32
    return %c0_i32, %c0_i32_0 : i32, i32
  }
  func.func @transform_4(%arg0: i32) -> (i32, i32) {
    %c0_i32 = arith.constant 0 : i32
    %c0_i32_0 = arith.constant 0 : i32
    %c0_i32_1 = arith.constant 0 : i32
    return %c0_i32, %c0_i32_0 : i32, i32
  }
  func.func @transform_5(%arg0: i32) -> (i32, i32) {
    %c0_i32 = arith.constant 0 : i32
    %c0_i32_0 = arith.constant 0 : i32
    return %c0_i32, %arg0 : i32, i32
  }
}

</mosaic_0001>

<bundles_post_ra>
// kernel: tpu_custom_call.1
= control target key start
LH: loop header
LB: loop body
LE: loop exit
PB: predicated region body
PF: predicated region fallthrough
CT: control target
= control target key end

     0   :  { %10 = vsyncpa [#allocation4], 0  ;;  %s747_s0 = inlined_call_operand.vmem [shape: f32[2,256], index: 0, kind: input, shape index: {}]   ;;  %s748_s1 = inlined_call_operand.vmem [shape: f32[40,2], index: 1, kind: input, shape index: {}]   ;;  %s749_s2 = inlined_call_operand.vmem [shape: f32[2,40], index: 2, kind: input, shape index: {}]   ;;  %s750_s3 = inlined_call_operand.vmem [shape: f32[2,3], index: 3, kind: input, shape index: {}]   ;;  %s751_s4 = inlined_call_operand.vmem [shape: f32[2,3], index: 4, kind: input, shape index: {}]   ;;  %s752_s5 = inlined_call_operand.hbm [shape: f32[2,256], index: 5, kind: output, shape index: {}]  }
   0x1   :  { %11 = vsyncpa [#allocation6], 0 }
   0x2   :  { %12 = vsyncpa [#allocation3], 0  ;;  %s24_s20 = sshll.u32 %s750_s3, 4  ;;  %s33_s23 = sshll.u32 %s751_s4, 4  ;;  %s25_s20 = int_to_ptr.vmem [resolvable:$true] %s24_s20  ;;  %s34_s23 = int_to_ptr.vmem [resolvable:$true] %s33_s23 }
   0x3   :  { %s586_s24 = smov [#allocation2]   ;;  %s587_s25 = smov [#allocation5]  }
   0x4   :  { %27 = dma.vmem_to_smem %s25_s20, 32, %s586_s24, [#allocation4]  }
   0x5   :  { %36 = dma.vmem_to_smem %s34_s23, 32, %s587_s25, [#allocation6]  }
   0x6   :  { %580 = dma.done.wait [#allocation4], 32  }
   0x7   :  { %581 = vsyncadd [#allocation4], 4294967264 }
   0x8   :  { %582 = dma.done.wait [#allocation6], 32  }
   0x9   :  { %583 = vsyncadd [#allocation6], 4294967264 }
   0xa   :  { %45 = sfence }
   0xb   :  { %v53_v0 = vld [vmem:[%s748_s1 + $0x20] sm:$0xff]  ;;  %v52_v1 = vld [vmem:[%s748_s1 + $0x18] sm:$0xff]  ;;  %v588_v2 = vmov 1   ;;  %v589_v3 = vmov 0   ;;  %v51_v4 = vld [vmem:[%s748_s1 + $0x10] sm:$0xff]  ;;  %vm210_vm0 = vcmask 326656  }
   0xc   :  { %503 = vset.pattern.permute.xlu0 %v588_v2  ;;  %505 = vset.pattern.permute.xlu1 %v589_v3  ;;  %v49_v5 = vld [vmem:[%s748_s1] sm:$0xff]  ;;  %v50_v6 = vld [vmem:[%s748_s1 + $0x8] sm:$0xff]  ;;  %s478_s13 = sld [smem:[#allocation2 + $0x81]]  ;;  %vm305_vm1 = vcmask 1040384   ;;  %s591_s24 = smov [#allocation7]  }
   0xd   :  { %116 = vperm.xlu0 %503, %v53_v0   ;;  %76 = vperm.xlu1 %505, %v52_v1   ;;  %v646_v8 = vld [vmem:[%s747_s0] ss:$2 sm:$0x3]  ;;  %v651_v9 = vld [vmem:[%s747_s0 + $0x1] ss:$2 sm:$0x3] }
   0xe   :  { %507 = vset.pattern.permute.xlu2 %v589_v3  ;;  %v654_v10 = vperm.slane %v646_v8, 0  ;;  %v657_v11 = vperm.slane %v651_v9, 0  ;;  %v660_v13 = vperm.slane %v646_v8, 1  ;;  %v663_v14 = vperm.slane %v651_v9, 1  ;;  %s475_s14 = sld [smem:[#allocation2 + $0x1]]  ;;  %s459_s25 = sshll.u32 %s591_s24, 4  ;;  %s460_s25 = int_to_ptr.vmem [resolvable:$true] %s459_s25 }
   0xf   :  { %71 = vperm.xlu2 %507, %v51_v4   ;;  %s479_s15 = sld [smem:[#allocation2 + $0x82]]  ;;  %s461_s3 = sshll.u32 %s752_s5, 4  ;;  %s462_s3 = int_to_ptr.hbm [resolvable:$true] %s461_s3 }
  0x10   :  { %s476_s16 = sld [smem:[#allocation2 + $0x2]] }
  0x11   :  { %s254_s17 = sld [smem:[#allocation2]] }
  0x12   :  { %s477_s18 = sld [smem:[#allocation2 + $0x80]] }
  0x13   :  { %s738_s19 = sld [smem:[#allocation5 + $0x80]] }
  0x14   :  { %s488_s20 = sld [smem:[#allocation5 + $0x1]] }
  0x15   :  { %504 = vset.pattern.permute.xlu0 %v589_v3  ;;  %506 = vset.pattern.permute.xlu1 %v588_v2  ;;  %s491_s21 = sld [smem:[#allocation5 + $0x81]] }
  0x16   :  { %81 = vperm.xlu0 %504, %v53_v0   ;;  %112 = vperm.xlu1 %506, %v52_v1   ;;  %s489_s22 = sld [smem:[#allocation5 + $0x2]] }
  0x17   :  { %508 = vset.pattern.permute.xlu2 %v588_v2  ;;  %s492_s23 = sld [smem:[#allocation5 + $0x82]] }
  0x18   :  { %108 = vperm.xlu2 %508, %v51_v4  }
  0x1e   :  { %509 = vset.pattern.permute.xlu1 %v589_v3  ;;  %61 = vperm.xlu0 %504, %v49_v5  }
  0x1f   :  { %66 = vperm.xlu1 %509, %v50_v6  }
  0x20   :  { %104 = vperm.xlu2 %508, %v50_v6  }
  0x26   :  { %511 = vset.pattern.permute.xlu0 %v588_v2 }
  0x27   :  { %510 = vset.pattern.permute.xlu1 %v588_v2 }
  0x28   :  { %100 = vperm.xlu1 %510, %v49_v5  }
  0x69   :  { %v72_v7 = vpop.permute.xlu2 %71 }
  0x6a   :  { %v88_v15 = vsub.f32 %v654_v10, %v72_v7  ;;  %v89_v17 = vsub.f32 %v660_v13, %v72_v7 }
  0x6c   :  { %v133_v19 = vmul.f32 %v88_v15, %v88_v15  ;;  %v134_v23 = vmul.f32 %v89_v17, %v89_v17 }
  0x72   :  { %v109_v12 = vpop.permute.xlu2 %108 }
  0x73   :  { %v123_v16 = vsub.f32 %v657_v11, %v109_v12  ;;  %v124_v18 = vsub.f32 %v663_v14, %v109_v12 }
  0x75   :  { %v143_v20 = vmul.f32 %v123_v16, %v123_v16  ;;  %v144_v24 = vmul.f32 %v124_v18, %v124_v18 }
  0x77   :  { %v669_v25 = vadd.f32 %v143_v20, %v133_v19  ;;  %v673_v28 = vadd.f32 %v144_v24, %v134_v23 }
  0x79   :  { %v163_v31 = vadd.f32 1e-12, %v669_v25  ;;  %v164_v36 = vadd.f32 1e-12, %v673_v28 }
  0x7a   :  { %v105_v41 = vpop.permute.xlu2 %104 }
  0x7b   :  { %512 = vlog2.f32 %v163_v31  ;;  %v121_v48 = vsub.f32 %v657_v11, %v105_v41  ;;  %v122_v53 = vsub.f32 %v663_v14, %v105_v41 }
  0x7c   :  { %514 = vlog2.f32 %v164_v36 }
  0x7d   :  { %v141_v59 = vmul.f32 %v121_v48, %v121_v48  ;;  %v142_v62 = vmul.f32 %v122_v53, %v122_v53 }
  0x7f   :  { %v77_v21 = vpop.permute.xlu1 %76  ;;  %v117_v22 = vpop.permute.xlu0 %116 }
  0x80   :  { %v127_v26 = vsub.f32 %v657_v11, %v117_v22  ;;  %v128_v27 = vsub.f32 %v663_v14, %v117_v22  ;;  %v90_v29 = vsub.f32 %v654_v10, %v77_v21  ;;  %v91_v30 = vsub.f32 %v660_v13, %v77_v21 }
  0x81   :  { %v513_v57 = vpop.eup %512 }
  0x82   :  { %v147_v32 = vmul.f32 %v127_v26, %v127_v26  ;;  %v148_v33 = vmul.f32 %v128_v27, %v128_v27  ;;  %v135_v42 = vmul.f32 %v90_v29, %v90_v29  ;;  %v136_v43 = vmul.f32 %v91_v30, %v91_v30  ;;  %v515_v61 = vpop.eup %514 }
  0x83   :  { %v178_v4 = vmul.f32 0.6931472, %v513_v57  ;;  %v180_v5 = vmul.f32 0.6931472, %v515_v61 }
  0x85   :  { %v193_v23 = vmul.f32 0.5, %v178_v4  ;;  %v194_v24 = vmul.f32 0.5, %v180_v5  ;;  %v255_v5 = vstv %s254_s17 }
  0x88   :  { %v82_v34 = vpop.permute.xlu0 %81  ;;  %v113_v35 = vpop.permute.xlu1 %112 }
  0x89   :  { %v92_v37 = vsub.f32 %v654_v10, %v82_v34  ;;  %v93_v38 = vsub.f32 %v660_v13, %v82_v34  ;;  %v125_v39 = vsub.f32 %v657_v11, %v113_v35  ;;  %v126_v40 = vsub.f32 %v663_v14, %v113_v35 }
  0x8b   :  { %v137_v44 = vmul.f32 %v92_v37, %v92_v37  ;;  %v138_v45 = vmul.f32 %v93_v38, %v93_v38  ;;  %v145_v46 = vmul.f32 %v125_v39, %v125_v39  ;;  %v146_v47 = vmul.f32 %v126_v40, %v126_v40 }
  0x8d   :  { %v157_v49 = vadd.f32 %v147_v32, %v137_v44  ;;  %v158_v50 = vadd.f32 %v148_v33, %v138_v45  ;;  %v155_v51 = vadd.f32 %v145_v46, %v135_v42  ;;  %v156_v52 = vadd.f32 %v146_v47, %v136_v43 }
  0x8e   :  { %v204_v47 = vmul.f32 %v194_v24, %v673_v28 }
  0x8f   :  { %v167_v54 = vadd.f32 1e-12, %v157_v49  ;;  %v168_v55 = vadd.f32 1e-12, %v158_v50  ;;  %v165_v56 = vadd.f32 1e-12, %v155_v51 }
  0x90   :  { %v166_v58 = vadd.f32 1e-12, %v156_v52  ;;  %v62_v1 = vpop.permute.xlu0 %61 }
  0x91   :  { %v67_v60 = vpop.permute.xlu1 %66  ;;  %516 = vlog2.f32 %v167_v54  ;;  %v84_v6 = vsub.f32 %v654_v10, %v62_v1  ;;  %v85_v17 = vsub.f32 %v660_v13, %v62_v1  ;;  %v269_v1 = vstv %s476_s16 }
  0x92   :  { %v86_v63 = vsub.f32 %v654_v10, %v67_v60  ;;  %v87_v0 = vsub.f32 %v660_v13, %v67_v60  ;;  %518 = vlog2.f32 %v168_v55  ;;  %v209_v60 = vld [vmem:[%s749_s2] sm:$0x3]  ;;  %s735_s2 = sld [smem:[#allocation5]] }
  0x93   :  { %520 = vlog2.f32 %v165_v56  ;;  %v129_v27 = vmul.f32 %v84_v6, %v84_v6  ;;  %v130_v13 = vmul.f32 %v85_v17, %v85_v17  ;;  %v270_v6 = vmul.f32 %v651_v9, %v269_v1 }
  0x94   :  { %v131_v2 = vmul.f32 %v86_v63, %v86_v63  ;;  %v132_v3 = vmul.f32 %v87_v0, %v87_v0  ;;  %522 = vlog2.f32 %v166_v58  ;;  %v259_v63 = vstv %s475_s14 }
  0x95   :  { %v293_v0 = vstv %s479_s15  ;;  %v273_v24 = vperm.slane %v270_v6, 1 }
  0x96   :  { %v151_v7 = vadd.f32 %v141_v59, %v131_v2  ;;  %v152_v12 = vadd.f32 %v142_v62, %v132_v3  ;;  %v283_v62 = vstv %s478_s13  ;;  %v260_v3 = vmul.f32 %v259_v63, %v646_v8 }
  0x97   :  { %v517_v15 = vpop.eup %516  ;;  %v284_v2 = vmul.f32 %v283_v62, %v646_v8  ;;  %v294_v4 = vmul.f32 %v651_v9, %v293_v0 }
  0x98   :  { %v519_v16 = vpop.eup %518  ;;  %v186_v18 = vmul.f32 0.6931472, %v517_v15  ;;  %v161_v19 = vadd.f32 1e-12, %v151_v7  ;;  %v162_v20 = vadd.f32 1e-12, %v152_v12 }
  0x99   :  { %v521_v21 = vpop.eup %520  ;;  %v188_v22 = vmul.f32 0.6931472, %v519_v16  ;;  %v262_v16 = vperm.slane %v260_v3, 0  ;;  %v263_v17 = vperm.slane %v260_v3, 1 }
  0x9a   :  { %v523_v26 = vpop.eup %522  ;;  %v101_v29 = vpop.permute.xlu1 %100  ;;  %v197_v30 = vmul.f32 0.5, %v186_v18  ;;  %v182_v31 = vmul.f32 0.6931472, %v521_v21  ;;  %524 = vlog2.f32 %v161_v19  ;;  %v287_v18 = vperm.slane %v284_v2, 1 }
  0x9b   :  { %v119_v10 = vsub.f32 %v657_v11, %v101_v29  ;;  %v120_v32 = vsub.f32 %v663_v14, %v101_v29  ;;  %v198_v33 = vmul.f32 0.5, %v188_v22  ;;  %v184_v34 = vmul.f32 0.6931472, %v523_v26 }
  0x9c   :  { %v207_v35 = vmul.f32 %v197_v30, %v157_v49  ;;  %v195_v36 = vmul.f32 0.5, %v182_v31  ;;  %526 = vlog2.f32 %v162_v20  ;;  %v203_v11 = vmul.f32 %v193_v23, %v669_v25 }
  0x9d   :  { %v139_v37 = vmul.f32 %v119_v10, %v119_v10  ;;  %v140_v38 = vmul.f32 %v120_v32, %v120_v32  ;;  %v208_v39 = vmul.f32 %v198_v33, %v158_v50  ;;  %v196_v40 = vmul.f32 0.5, %v184_v34 }
  0x9e   :  { %225 = vmatpush.msra.mxu0 %v207_v35  ;;  %v205_v41 = vmul.f32 %v195_v36, %v155_v51  ;;  %v296_v21 = vperm.slane %v294_v4, 0  ;;  %v272_v31 = vperm.slane %v270_v6, 0 }
  0x9f   :  { %v149_v42 = vadd.f32 %v139_v37, %v129_v27  ;;  %v150_v43 = vadd.f32 %v140_v38, %v130_v13  ;;  %245 = vmatpush.msra.mxu1 %v208_v39  ;;  %v206_v44 = vmul.f32 %v196_v40, %v156_v52  ;;  %v297_v27 = vperm.slane %v294_v4, 1 }
  0xa0   :  { %v525_v45 = vpop.eup %524  ;;  %226 = vmatpush.msra.mxu0 %v205_v41 }
  0xa1   :  { %v159_v14 = vadd.f32 1e-12, %v149_v42  ;;  %v160_v46 = vadd.f32 1e-12, %v150_v43  ;;  %246 = vmatpush.msra.mxu1 %v206_v44  ;;  %v174_v48 = vmul.f32 0.6931472, %v525_v45 }
  0xa2   :  { %v527_v49 = vpop.eup %526  ;;  %227 = vmatpush.msra.mxu0 %v203_v11 }
  0xa3   :  { %528 = vlog2.f32 %v159_v14  ;;  %247 = vmatpush.msra.mxu1 %v204_v47  ;;  %v191_v50 = vmul.f32 0.5, %v174_v48  ;;  %v176_v51 = vmul.f32 0.6931472, %v527_v49 }
  0xa4   :  { %530 = vlog2.f32 %v160_v46 }
  0xa5   :  { %v201_v53 = vmul.f32 %v191_v50, %v151_v7  ;;  %v192_v54 = vmul.f32 0.5, %v176_v51  ;;  %v279_v7 = vstv %s477_s18 }
  0xa7   :  { %228 = vmatpush.msra.mxu0 %v201_v53  ;;  %v202_v52 = vmul.f32 %v192_v54, %v152_v12  ;;  %v286_v12 = vperm.slane %v284_v2, 0 }
  0xa9   :  { %v529_v55 = vpop.eup %528  ;;  %248 = vmatpush.msra.mxu1 %v202_v52 }
  0xaa   :  { %v531_v25 = vpop.eup %530  ;;  %v170_v56 = vmul.f32 0.6931472, %v529_v55 }
  0xab   :  { %v172_v57 = vmul.f32 0.6931472, %v531_v25 }
  0xac   :  { %v189_v58 = vmul.f32 0.5, %v170_v56 }
  0xad   :  { %v190_v59 = vmul.f32 0.5, %v172_v57 }
  0xae   :  { %v199_v28 = vmul.f32 %v189_v58, %v149_v42 }
  0xaf   :  { %v200_v61 = vmul.f32 %v190_v59, %v150_v43 }
  0xb0   :  { %229 = vmatpush.msra.mxu0 %v199_v28 }
  0xb1   :  { %249 = vmatpush.msra.mxu1 %v200_v61  ;;  %473 = vmatmul.msk.f32.vlgmr.msra.gmra.mxu0 %vm210_vm0, %v209_v60  ;;  %v590_v61 = vmov 0.0  }
  0xb2   :  { %474 = vmatmul.msk.f32.vlgmr.msra.gmra.mxu1 %vm210_vm0, %v209_v60 }
 0x12e   :  { %v231_v15 = vpop.f32.mrf.mxu0 }
 0x12f   :  { %v256_v19 = vadd.f32 %v255_v5, %v231_v15  ;;  %v280_v20 = vadd.f32 %v279_v7, %v231_v15  ;;  %v251_v22 = vpop.f32.mrf.mxu1 }
 0x130   :  { %v257_v23 = vadd.f32 %v255_v5, %v251_v22  ;;  %v281_v26 = vadd.f32 %v279_v7, %v251_v22 }
 0x131   :  { %v290_v29 = vadd.f32 %v286_v12, %v280_v20  ;;  %v266_v30 = vadd.f32 %v262_v16, %v256_v19 }
 0x132   :  { %v267_v10 = vadd.f32 %v263_v17, %v257_v23  ;;  %v291_v32 = vadd.f32 %v287_v18, %v281_v26 }
 0x133   :  { %v300_v33 = vadd.f32 %v296_v21, %v290_v29  ;;  %v276_v35 = vadd.f32 %v272_v31, %v266_v30 }
 0x134   :  { %v277_v34 = vadd.f32 %v273_v24, %v267_v10  ;;  %v301_v13 = vadd.f32 %v297_v27, %v291_v32 }
 0x135   :  { %311 = vst [vmem:[#allocation1] sm:$0xff] %v300_v33 }
 0x136   :  { %v304_v36 = vrot.slane %v277_v34, 7  ;;  %312 = vst [vmem:[#allocation1 + $0x9] sm:$0xff] %v301_v13 }
 0x138   :  { %v306_v37 = vsel %vm305_vm1, %v276_v35, %v304_v36 }
 0x139   :  { %v308_v38 = vadd.f32 %v306_v37, %v646_v8 }
 0x13b   :  { %v317_v39 = vadd.f32 1.0, %v308_v38 }
 0x13d   :  { %v314_v40 = vld [vmem:[#allocation1 + $0x1] ss:$9 sm:$0xff]  ;;  %v318_v41 = vmul.f32 7.5, %v317_v39 }
 0x13e   :  { %v316_v42 = vadd.f32 %v651_v9, %v314_v40 }
 0x13f   :  { %v321_v43 = vfloor.f32 %v318_v41 }
 0x140   :  { %v319_v44 = vadd.f32 1.0, %v316_v42  ;;  %v417_v42 = vstv %s488_s20 }
 0x141   :  { %v494_v45 = vcvt.f32.s32 %v321_v43  ;;  %v703_v14 = vsub.f32 %v318_v41, %v321_v43  ;;  %v414_v41 = vstv %s735_s2  ;;  %v425_v43 = vstv %s738_s19 }
 0x142   :  { %v320_v11 = vmul.f32 7.5, %v319_v44  ;;  %v428_v44 = vstv %s491_s21 }
 0x143   :  { %v329_v46 = vadd.s32 1, %v494_v45  ;;  %vm335_vm2 = vcmp.ge.s32.totalorder %v494_v45, 0  ;;  %vm336_vm3 = vcmp.lt.s32.totalorder %v494_v45, 16  ;;  %vm345_vm4 = vcmp.gt.s32.totalorder %v494_v45, 0 }
 0x144   :  { %v322_v47 = vfloor.f32 %v320_v11  ;;  %v346_v48 = vsel %vm345_vm4, %v494_v45, 0  ;;  %v324_v51 = vsub.f32 1.0, %v703_v14  ;;  %vm708_vm10 = vmand %vm335_vm2, %vm336_vm3 }
 0x145   :  { %vm364_vm5 = vcmp.ge.s32.totalorder %v329_v46, 0  ;;  %vm365_vm6 = vcmp.lt.s32.totalorder %v329_v46, 16  ;;  %vm372_vm7 = vcmp.gt.s32.totalorder %v329_v46, 0  ;;  %vm347_vm8 = vcmp.lt.s32.totalorder %v346_v48, 15 }
 0x146   :  { %v325_v8 = vsub.f32 %v320_v11, %v322_v47  ;;  %v496_v49 = vcvt.f32.s32 %v322_v47  ;;  %v373_v50 = vsel %vm372_vm7, %v329_v46, 0  ;;  %v348_v9 = vsel %vm347_vm8, %v346_v48, 15  ;;  %vm714_vm14 = vmand %vm364_vm5, %vm365_vm6 }
 0x147   :  { %vm374_vm9 = vcmp.lt.s32.totalorder %v373_v50, 15  ;;  %v349_v55 = vcvt.s32.f32 %v348_v9  ;;  %v432_v46 = vstv %s492_s23 }
 0x148   :  { %v326_v53 = vsub.f32 1.0, %v325_v8  ;;  %v330_v54 = vadd.s32 1, %v496_v49  ;;  %vm338_vm11 = vcmp.ge.s32.totalorder %v496_v49, 0  ;;  %vm340_vm12 = vcmp.lt.s32.totalorder %v496_v49, 16 }
 0x149   :  { %vm352_vm13 = vcmp.gt.s32.totalorder %v496_v49, 0  ;;  %vm339_vm15 = vmand %vm708_vm10, %vm338_vm11  ;;  %v375_v59 = vsel %vm374_vm9, %v373_v50, 15  ;;  %v350_v28 = vmul.f32 0.13333334, %v349_v55  ;;  %v333_v4 = vmul.f32 %v325_v8, %v324_v51 }
 0x14a   :  { %v331_v56 = vmul.f32 %v326_v53, %v324_v51  ;;  %v332_v57 = vmul.f32 %v326_v53, %v703_v14  ;;  %v353_v58 = vsel %vm352_vm13, %v496_v49, 0  ;;  %vm341_vm0 = vmand %vm339_vm15, %vm340_vm12  ;;  %v376_v60 = vcvt.s32.f32 %v375_v59 }
 0x14b   :  { %vm354_vm2 = vcmp.lt.s32.totalorder %v353_v58, 15  ;;  %vm384_vm3 = vcmp.ge.s32.totalorder %v330_v54, 0  ;;  %v480_v62 = vsel %vm341_vm0, 1.0, %v590_v61  ;;  %vm367_vm4 = vmand %vm714_vm14, %vm338_vm11  ;;  %vm386_vm5 = vcmp.lt.s32.totalorder %v330_v54, 16 }
 0x14c   :  { %v355_v63 = vsel %vm354_vm2, %v353_v58, 15  ;;  %vm391_vm6 = vcmp.gt.s32.totalorder %v330_v54, 0  ;;  %v344_v0 = vmul.f32 %v480_v62, %v331_v56  ;;  %v481_v1 = vadd.f32 -1.0, %v350_v28  ;;  %vm368_vm7 = vmand %vm367_vm4, %vm340_vm12 }
 0x14d   :  { %v356_v2 = vcvt.s32.f32 %v355_v63  ;;  %v377_v3 = vmul.f32 0.13333334, %v376_v60  ;;  %v483_v5 = vsel %vm368_vm7, 1.0, %v590_v61  ;;  %vm385_vm8 = vmand %vm708_vm10, %vm384_vm3  ;;  %v392_v6 = vsel %vm391_vm6, %v330_v54, 0 }
 0x14e   :  { %v359_v12 = vmul.f32 %v481_v1, %v344_v0  ;;  %v371_v15 = vmul.f32 %v483_v5, %v332_v57  ;;  %vm387_vm9 = vmand %vm385_vm8, %vm386_vm5  ;;  %vm393_vm11 = vcmp.lt.s32.totalorder %v392_v6, 15  ;;  %v334_v21 = vmul.f32 %v325_v8, %v703_v14 }
 0x14f   :  { %v357_v7 = vmul.f32 0.13333334, %v356_v2  ;;  %v484_v16 = vadd.f32 -1.0, %v377_v3  ;;  %v485_v17 = vsel %vm387_vm9, 1.0, %v590_v61  ;;  %vm403_vm12 = vmand %vm714_vm14, %vm384_vm3  ;;  %v394_v22 = vsel %vm393_vm11, %v392_v6, 15 }
 0x150   :  { %v390_v20 = vmul.f32 %v485_v17, %v333_v4  ;;  %vm404_vm13 = vmand %vm403_vm12, %vm386_vm5  ;;  %v395_v29 = vcvt.s32.f32 %v394_v22  ;;  %v383_v31 = vadd.f32 %v371_v15, %v344_v0  ;;  %v421_v14 = vstv %s489_s22 }
 0x151   :  { %v482_v18 = vadd.f32 -1.0, %v357_v7  ;;  %v379_v19 = vmul.f32 %v484_v16, %v371_v15  ;;  %v487_v23 = vsel %vm404_vm13, 1.0, %v590_v61  ;;  %vm450_vm10 = vcmask 1041408  }
 0x152   :  { %v398_v30 = vmul.f32 %v481_v1, %v390_v20  ;;  %v396_v10 = vmul.f32 0.13333334, %v395_v29  ;;  %v407_v32 = vmul.f32 %v487_v23, %v334_v21  ;;  %v402_v36 = vadd.f32 %v390_v20, %v383_v31 }
 0x153   :  { %v361_v24 = vmul.f32 %v482_v18, %v344_v0  ;;  %v380_v26 = vadd.f32 %v379_v19, %v359_v12  ;;  %v381_v27 = vmul.f32 %v482_v18, %v371_v15 }
 0x154   :  { %v486_v34 = vadd.f32 -1.0, %v396_v10  ;;  %v408_v37 = vmul.f32 %v484_v16, %v407_v32  ;;  %v412_v11 = vadd.f32 %v407_v32, %v402_v36 }
 0x155   :  { %v382_v33 = vadd.f32 %v381_v27, %v361_v24  ;;  %v399_v13 = vadd.f32 %v398_v30, %v380_v26 }
 0x156   :  { %v400_v35 = vmul.f32 %v486_v34, %v390_v20  ;;  %v410_v40 = vmul.f32 %v486_v34, %v407_v32  ;;  %v422_v9 = vmul.f32 %v421_v14, %v412_v11  ;;  %v433_v53 = vmul.f32 %v432_v46, %v412_v11 }
 0x157   :  { %v409_v39 = vadd.f32 %v408_v37, %v399_v13 }
 0x158   :  { %v401_v38 = vadd.f32 %v400_v35, %v382_v33 }
 0x159   :  { %v415_v47 = vmul.f32 %v414_v41, %v409_v39  ;;  %v426_v8 = vmul.f32 %v425_v43, %v409_v39 }
 0x15a   :  { %v411_v45 = vadd.f32 %v410_v40, %v401_v38 }
 0x15c   :  { %v418_v48 = vmul.f32 %v417_v42, %v411_v45  ;;  %v429_v49 = vmul.f32 %v428_v44, %v411_v45 }
 0x15e   :  { %v419_v50 = vadd.f32 %v418_v48, %v415_v47  ;;  %v430_v51 = vadd.f32 %v429_v49, %v426_v8 }
 0x160   :  { %v423_v54 = vadd.f32 %v422_v9, %v419_v50  ;;  %v434_v52 = vadd.f32 %v433_v53, %v430_v51 }
 0x162   :  { %v436_v55 = vperm.slane %v423_v54, 0  ;;  %v437_v25 = vperm.slane %v423_v54, 1  ;;  %v441_v56 = vperm.slane %v434_v52, 0  ;;  %v442_v57 = vperm.slane %v434_v52, 1 }
 0x164   :  { %v446_v58 = vsel %vm305_vm1, %v437_v25, %v442_v57  ;;  %v445_v28 = vsel %vm305_vm1, %v436_v55, %v441_v56 }
 0x165   :  { %v449_v59 = vrot.slane %v446_v58, 6 }
 0x167   :  { %v451_v60 = vsel %vm450_vm10, %v445_v28, %v449_v59 }
 0x168   :  { %453 = vst [vmem:[#allocation7] sm:$0xf] %v451_v60 }
 0x169   :  { %464 = dma.vmem_to_hbm [thread:$0]  %s460_s25, 64, %s462_s3, [#allocation3]  }
 0x16a   :  { %584 = dma.done.wait [#allocation3], 64  }
 0x16b   :  { %585 = vsyncadd [#allocation3], 4294967232 }
 0x16c   :  { %469 = vsyncpa [#allocation3], 1 }
 0x16d   :  { %470 = vsyncpa [#allocation4], 1 }
 0x16e   :  { %471 = vsyncpa [#allocation6], 1 }

</bundles_post_ra>
